<compile_context>
chip_gen: v6e
topology: v6e:2x2x1
jax: 0.10.0
libtpu: 0.0.40
codegen_flags: <defaults>
</compile_context>

<pallas_src>
import functools

import jax
import jax.numpy as jnp
from jax.experimental import pallas as pl
from jax.experimental.pallas import tpu as pltpu

LANE = 128
SUBLANE = 8


def _round_up(v, m):
    return ((v + m - 1) // m) * m


def _pad_to(a, shape):
    pads = [(0, s - d) for d, s in zip(a.shape, shape)]
    return jnp.pad(a, pads)


def _fused_gcn_kernel(adj_ref, x_ref, *refs, layer_meta):
    """All GCN layers fused: intermediates stay in registers/VMEM.

    refs = (w0, b0, w1, b1, ..., w_{L-1}, b_{L-1}, out_ref)
    layer_meta[l] = (apply_relu, agg_first)  -- static Python metadata.
    """
    num_layers = len(layer_meta)
    o_ref = refs[-1]
    wb = refs[:-1]

    adj = adj_ref[...]          # bf16 [Np, Np]
    h = x_ref[...]              # bf16 [Np, F0p]

    for l, (apply_relu, agg_first) in enumerate(layer_meta):
        w = wb[2 * l][...]      # bf16 [Fin_p, Fout_p]
        b = wb[2 * l + 1][...]  # f32  [1, Fout_p]

        if agg_first:
            # (adj @ h) @ W : cheaper when Fin < Fout
            t = jnp.dot(adj, h, preferred_element_type=jnp.float32)
            out = jnp.dot(t.astype(jnp.bfloat16), w,
                          preferred_element_type=jnp.float32)
        else:
            # adj @ (h @ W) : cheaper when Fout <= Fin
            t = jnp.dot(h, w, preferred_element_type=jnp.float32)
            out = jnp.dot(adj, t.astype(jnp.bfloat16),
                          preferred_element_type=jnp.float32)

        out = out + b                       # f32 epilogue
        if apply_relu:
            out = jnp.maximum(out, 0.0)

        if l < num_layers - 1:
            h = out.astype(jnp.bfloat16)    # bf16 feed to next layer's MXU
        else:
            h = out                         # final layer stays f32

    o_ref[...] = h.astype(o_ref.dtype)


def gcn_forward_fused(x, adj, params):
    """Full GCN forward pass as one fused pallas_call."""
    n, f_in = x.shape
    num_layers = len(params)
    dims = [f_in] + [w.shape[1] for w, _ in params]

    n_pad = _round_up(n, SUBLANE)
    dims_pad = [_round_up(d, LANE) for d in dims]

    adj_p = _pad_to(adj, (n_pad, n_pad)).astype(jnp.bfloat16)
    x_p = _pad_to(x, (n_pad, dims_pad[0])).astype(jnp.bfloat16)

    inputs = [adj_p, x_p]
    in_specs = [
        pl.BlockSpec((n_pad, n_pad), lambda i: (0, 0)),
        pl.BlockSpec((n_pad, dims_pad[0]), lambda i: (0, 0)),
    ]

    layer_meta = []
    flops = 0
    bytes_accessed = adj_p.size * 2 + x_p.size * 2
    for l, (w, b) in enumerate(params):
        fi, fo = w.shape
        fip, fop = dims_pad[l], dims_pad[l + 1]
        w_p = _pad_to(w, (fip, fop)).astype(jnp.bfloat16)
        b_p = _pad_to(b.reshape(1, fo), (1, fop)).astype(jnp.float32)
        inputs += [w_p, b_p]
        in_specs += [
            pl.BlockSpec((fip, fop), lambda i: (0, 0)),
            pl.BlockSpec((1, fop), lambda i: (0, 0)),
        ]
        agg_first = fi < fo  # put the N^2 term on min(Fin, Fout)
        layer_meta.append((l < num_layers - 1, agg_first))
        n2_width = fip if agg_first else fop
        flops += 2 * n_pad * n_pad * n2_width + 2 * n_pad * fip * fop
        bytes_accessed += w_p.size * 2 + b_p.size * 4
    bytes_accessed += n_pad * dims_pad[-1] * 4

    out_pad_shape = (n_pad, dims_pad[-1])
    kernel = functools.partial(_fused_gcn_kernel, layer_meta=tuple(layer_meta))

    out = pl.pallas_call(
        kernel,
        out_shape=jax.ShapeDtypeStruct(out_pad_shape, jnp.float32),
        grid_spec=pltpu.PrefetchScalarGridSpec(
            num_scalar_prefetch=0,
            grid=(1,),
            in_specs=in_specs,
            out_specs=pl.BlockSpec(out_pad_shape, lambda i: (0, 0)),
        ),
        compiler_params=pltpu.CompilerParams(
            dimension_semantics=("arbitrary",)),
        cost_estimate=pl.CostEstimate(
            flops=flops, transcendentals=0, bytes_accessed=bytes_accessed),
    )(*inputs)

    return out[:n, :dims[-1]]


def gcn_reference(x, adj, params):
    """Pure-JAX reference mirroring the kernel's bf16 MXU / f32 epilogue path."""
    adj_b = adj.astype(jnp.bfloat16)
    h = x.astype(jnp.bfloat16)
    num_layers = len(params)
    for l, (w, b) in enumerate(params):
        fi, fo = w.shape
        w_b = w.astype(jnp.bfloat16)
        if fi < fo:
            t = jnp.dot(adj_b, h, preferred_element_type=jnp.float32)
            out = jnp.dot(t.astype(jnp.bfloat16), w_b,
                          preferred_element_type=jnp.float32)
        else:
            t = jnp.dot(h, w_b, preferred_element_type=jnp.float32)
            out = jnp.dot(adj_b, t.astype(jnp.bfloat16),
                          preferred_element_type=jnp.float32)
        out = out + b
        if l < num_layers - 1:
            out = jnp.maximum(out, 0.0)
            h = out.astype(jnp.bfloat16)
        else:
            h = out
    return h


def _glorot(key, fan_in, fan_out):
    limit = jnp.sqrt(6.0 / (fan_in + fan_out))
    return jax.random.uniform(key, (fan_in, fan_out), jnp.float32, -limit, limit)


def make_params(key, in_channels, hidden_channels, out_channels, num_layers):
    dims = [in_channels] + [hidden_channels] * (num_layers - 1) + [out_channels]
    params = []
    for i in range(num_layers):
        key, wk = jax.random.split(key)
        w = _glorot(wk, dims[i], dims[i + 1])
        b = jnp.zeros((dims[i + 1],), jnp.float32)
        params.append((w, b))
    return params


def make_norm_adj(key, n):
    """Random undirected graph, GCN-normalized: D^{-1/2}(A + I)D^{-1/2}."""
    a = (jax.random.uniform(key, (n, n)) < 0.3).astype(jnp.float32)
    a = jnp.maximum(a, a.T)                      # symmetrize
    a = a + jnp.eye(n, dtype=jnp.float32)        # add self loops
    a = jnp.minimum(a, 1.0)
    deg = jnp.sum(a, axis=1)
    d_inv_sqrt = 1.0 / jnp.sqrt(deg)
    return a * d_inv_sqrt[:, None] * d_inv_sqrt[None, :]


if __name__ == "__main__":
    # Small deterministic problem: 16 nodes, in=8, hidden=32, out=16, 3 layers.
    key = jax.random.PRNGKey(0)
    k_x, k_adj, k_p = jax.random.split(key, 3)

    num_nodes = 16
    in_channels, hidden_channels, out_channels = 8, 32, 16
    num_layers = 3
    dropout = 0.5  # inactive in eval mode

    x = jax.random.normal(k_x, (num_nodes, in_channels), jnp.float32)
    adj = make_norm_adj(k_adj, num_nodes)
    params = make_params(k_p, in_channels, hidden_channels, out_channels,
                         num_layers)

    out = gcn_forward_fused(x, adj, params)
    out = jax.block_until_ready(out)

    ref = gcn_reference(x, adj, params)
    assert out.shape == (num_nodes, out_channels)
    assert jnp.allclose(out, ref, atol=1e-2, rtol=1e-2), (
        float(jnp.max(jnp.abs(out - ref))))

    print("KERNEL_OK")
</pallas_src>

<mosaic_0001>
module attributes {stable_mosaic.version = 11 : i64} {
  func.func @_fused_gcn_kernel(%arg0: i32, %arg1: memref<16x16xbf16, #tpu.memory_space<vmem>>, %arg2: memref<16x128xbf16, #tpu.memory_space<vmem>>, %arg3: memref<128x128xbf16, #tpu.memory_space<vmem>>, %arg4: memref<1x128xf32, #tpu.memory_space<vmem>>, %arg5: memref<128x128xbf16, #tpu.memory_space<vmem>>, %arg6: memref<1x128xf32, #tpu.memory_space<vmem>>, %arg7: memref<128x128xbf16, #tpu.memory_space<vmem>>, %arg8: memref<1x128xf32, #tpu.memory_space<vmem>>, %arg9: memref<16x128xf32, #tpu.memory_space<vmem>>) attributes {dimension_semantics = [#tpu.dimension_semantics<arbitrary>], iteration_bounds = array<i64: 1>, scalar_prefetch = 0 : i64, scratch_operands = 0 : i64, tpu.core_type = #tpu.core_type<tc>, window_params = [{pipeline_mode = #tpu.pipeline_mode<synchronous>, transform_indices = @transform_0, window_bounds = array<i64: 16, 16>}, {pipeline_mode = #tpu.pipeline_mode<synchronous>, transform_indices = @transform_1, window_bounds = array<i64: 16, 128>}, {pipeline_mode = #tpu.pipeline_mode<synchronous>, transform_indices = @transform_2, window_bounds = array<i64: 128, 128>}, {pipeline_mode = #tpu.pipeline_mode<synchronous>, transform_indices = @transform_3, window_bounds = array<i64: 1, 128>}, {pipeline_mode = #tpu.pipeline_mode<synchronous>, transform_indices = @transform_4, window_bounds = array<i64: 128, 128>}, {pipeline_mode = #tpu.pipeline_mode<synchronous>, transform_indices = @transform_5, window_bounds = array<i64: 1, 128>}, {pipeline_mode = #tpu.pipeline_mode<synchronous>, transform_indices = @transform_6, window_bounds = array<i64: 128, 128>}, {pipeline_mode = #tpu.pipeline_mode<synchronous>, transform_indices = @transform_7, window_bounds = array<i64: 1, 128>}, {pipeline_mode = #tpu.pipeline_mode<synchronous>, transform_indices = @transform_8, window_bounds = array<i64: 16, 128>}]} {
    %c0 = arith.constant 0 : index
    %c0_0 = arith.constant 0 : index
    %0 = vector.load %arg1[%c0, %c0_0] : memref<16x16xbf16, #tpu.memory_space<vmem>>, vector<16x16xbf16>
    %c0_1 = arith.constant 0 : index
    %c0_2 = arith.constant 0 : index
    %1 = vector.load %arg2[%c0_1, %c0_2] : memref<16x128xbf16, #tpu.memory_space<vmem>>, vector<16x128xbf16>
    %c0_3 = arith.constant 0 : index
    %c0_4 = arith.constant 0 : index
    %2 = vector.load %arg3[%c0_3, %c0_4] : memref<128x128xbf16, #tpu.memory_space<vmem>>, vector<128x128xbf16>
    %c0_5 = arith.constant 0 : index
    %c0_6 = arith.constant 0 : index
    %3 = vector.load %arg4[%c0_5, %c0_6] : memref<1x128xf32, #tpu.memory_space<vmem>>, vector<1x128xf32>
    %cst = arith.constant dense<0.000000e+00> : vector<16x128xf32>
    %4 = tpu.matmul %0, %1, %cst {dimension_numbers = #tpu.dot_dimension_numbers<[1], [0], [0], [1], [0, 0, 1, 1], [], []>} : vector<16x16xbf16>, vector<16x128xbf16>, vector<16x128xf32> -> vector<16x128xf32>
    %5 = arith.truncf %4 : vector<16x128xf32> to vector<16x128xbf16>
    %cst_7 = arith.constant dense<0.000000e+00> : vector<16x128xf32>
    %6 = tpu.matmul %5, %2, %cst_7 {dimension_numbers = #tpu.dot_dimension_numbers<[1], [0], [0], [1], [0, 0, 1, 1], [], []>} : vector<16x128xbf16>, vector<128x128xbf16>, vector<16x128xf32> -> vector<16x128xf32>
    %7 = vector.broadcast %3 : vector<1x128xf32> to vector<16x128xf32>
    %8 = arith.addf %6, %7 : vector<16x128xf32>
    %cst_8 = arith.constant 0.000000e+00 : f32
    %9 = vector.broadcast %cst_8 : f32 to vector<16x128xf32>
    %10 = arith.maximumf %8, %9 : vector<16x128xf32>
    %11 = arith.truncf %10 : vector<16x128xf32> to vector<16x128xbf16>
    %c0_9 = arith.constant 0 : index
    %c0_10 = arith.constant 0 : index
    %12 = vector.load %arg5[%c0_9, %c0_10] : memref<128x128xbf16, #tpu.memory_space<vmem>>, vector<128x128xbf16>
    %c0_11 = arith.constant 0 : index
    %c0_12 = arith.constant 0 : index
    %13 = vector.load %arg6[%c0_11, %c0_12] : memref<1x128xf32, #tpu.memory_space<vmem>>, vector<1x128xf32>
    %cst_13 = arith.constant dense<0.000000e+00> : vector<16x128xf32>
    %14 = tpu.matmul %11, %12, %cst_13 {dimension_numbers = #tpu.dot_dimension_numbers<[1], [0], [0], [1], [0, 0, 1, 1], [], []>} : vector<16x128xbf16>, vector<128x128xbf16>, vector<16x128xf32> -> vector<16x128xf32>
    %15 = arith.truncf %14 : vector<16x128xf32> to vector<16x128xbf16>
    %cst_14 = arith.constant dense<0.000000e+00> : vector<16x128xf32>
    %16 = tpu.matmul %0, %15, %cst_14 {dimension_numbers = #tpu.dot_dimension_numbers<[1], [0], [0], [1], [0, 0, 1, 1], [], []>} : vector<16x16xbf16>, vector<16x128xbf16>, vector<16x128xf32> -> vector<16x128xf32>
    %17 = vector.broadcast %13 : vector<1x128xf32> to vector<16x128xf32>
    %18 = arith.addf %16, %17 : vector<16x128xf32>
    %cst_15 = arith.constant 0.000000e+00 : f32
    %19 = vector.broadcast %cst_15 : f32 to vector<16x128xf32>
    %20 = arith.maximumf %18, %19 : vector<16x128xf32>
    %21 = arith.truncf %20 : vector<16x128xf32> to vector<16x128xbf16>
    %c0_16 = arith.constant 0 : index
    %c0_17 = arith.constant 0 : index
    %22 = vector.load %arg7[%c0_16, %c0_17] : memref<128x128xbf16, #tpu.memory_space<vmem>>, vector<128x128xbf16>
    %c0_18 = arith.constant 0 : index
    %c0_19 = arith.constant 0 : index
    %23 = vector.load %arg8[%c0_18, %c0_19] : memref<1x128xf32, #tpu.memory_space<vmem>>, vector<1x128xf32>
    %cst_20 = arith.constant dense<0.000000e+00> : vector<16x128xf32>
    %24 = tpu.matmul %21, %22, %cst_20 {dimension_numbers = #tpu.dot_dimension_numbers<[1], [0], [0], [1], [0, 0, 1, 1], [], []>} : vector<16x128xbf16>, vector<128x128xbf16>, vector<16x128xf32> -> vector<16x128xf32>
    %25 = arith.truncf %24 : vector<16x128xf32> to vector<16x128xbf16>
    %cst_21 = arith.constant dense<0.000000e+00> : vector<16x128xf32>
    %26 = tpu.matmul %0, %25, %cst_21 {dimension_numbers = #tpu.dot_dimension_numbers<[1], [0], [0], [1], [0, 0, 1, 1], [], []>} : vector<16x16xbf16>, vector<16x128xbf16>, vector<16x128xf32> -> vector<16x128xf32>
    %27 = vector.broadcast %23 : vector<1x128xf32> to vector<16x128xf32>
    %28 = arith.addf %26, %27 : vector<16x128xf32>
    %c0_22 = arith.constant 0 : index
    %c0_23 = arith.constant 0 : index
    %29 = vector.load %arg9[%c0_22, %c0_23] : memref<16x128xf32, #tpu.memory_space<vmem>>, vector<16x128xf32>
    tpu.vector_store %arg9[%c0_22, %c0_23], %28 {strides = array<i32>} : memref<16x128xf32, #tpu.memory_space<vmem>>, vector<16x128xf32>,
    return
  }
  func.func @transform_0(%arg0: i32) -> (i32, i32) {
    %c0_i32 = arith.constant 0 : i32
    %c0_i32_0 = arith.constant 0 : i32
    %c0_i32_1 = arith.constant 0 : i32
    return %c0_i32, %c0_i32_0 : i32, i32
  }
  func.func @transform_1(%arg0: i32) -> (i32, i32) {
    %c0_i32 = arith.constant 0 : i32
    %c0_i32_0 = arith.constant 0 : i32
    %c0_i32_1 = arith.constant 0 : i32
    return %c0_i32, %c0_i32_0 : i32, i32
  }
  func.func @transform_2(%arg0: i32) -> (i32, i32) {
    %c0_i32 = arith.constant 0 : i32
    %c0_i32_0 = arith.constant 0 : i32
    %c0_i32_1 = arith.constant 0 : i32
    return %c0_i32, %c0_i32_0 : i32, i32
  }
  func.func @transform_3(%arg0: i32) -> (i32, i32) {
    %c0_i32 = arith.constant 0 : i32
    %c0_i32_0 = arith.constant 0 : i32
    %c0_i32_1 = arith.constant 0 : i32
    return %c0_i32, %c0_i32_0 : i32, i32
  }
  func.func @transform_4(%arg0: i32) -> (i32, i32) {
    %c0_i32 = arith.constant 0 : i32
    %c0_i32_0 = arith.constant 0 : i32
    %c0_i32_1 = arith.constant 0 : i32
    return %c0_i32, %c0_i32_0 : i32, i32
  }
  func.func @transform_5(%arg0: i32) -> (i32, i32) {
    %c0_i32 = arith.constant 0 : i32
    %c0_i32_0 = arith.constant 0 : i32
    %c0_i32_1 = arith.constant 0 : i32
    return %c0_i32, %c0_i32_0 : i32, i32
  }
  func.func @transform_6(%arg0: i32) -> (i32, i32) {
    %c0_i32 = arith.constant 0 : i32
    %c0_i32_0 = arith.constant 0 : i32
    %c0_i32_1 = arith.constant 0 : i32
    return %c0_i32, %c0_i32_0 : i32, i32
  }
  func.func @transform_7(%arg0: i32) -> (i32, i32) {
    %c0_i32 = arith.constant 0 : i32
    %c0_i32_0 = arith.constant 0 : i32
    %c0_i32_1 = arith.constant 0 : i32
    return %c0_i32, %c0_i32_0 : i32, i32
  }
  func.func @transform_8(%arg0: i32) -> (i32, i32) {
    %c0_i32 = arith.constant 0 : i32
    %c0_i32_0 = arith.constant 0 : i32
    %c0_i32_1 = arith.constant 0 : i32
    return %c0_i32, %c0_i32_0 : i32, i32
  }
}

</mosaic_0001>

<bundles_post_ra>
// kernel: tpu_custom_call.1
= control target key start
LH: loop header
LB: loop body
LE: loop exit
PB: predicated region body
PF: predicated region fallthrough
CT: control target
= control target key end

     0   :  { %13 = vsyncpa [#allocation3], 0  ;;  %s1062_s0 = inlined_call_operand.hbm [shape: bf16[16,16], index: 0, kind: input, shape index: {}]   ;;  %s1063_s1 = inlined_call_operand.hbm [shape: bf16[16,128], index: 1, kind: input, shape index: {}]   ;;  %s1064_s2 = inlined_call_operand.hbm [shape: bf16[128,128], index: 2, kind: input, shape index: {}]   ;;  %s1065_s3 = inlined_call_operand.vmem [shape: f32[1,128], index: 3, kind: input, shape index: {}]   ;;  %s1066_s4 = inlined_call_operand.hbm [shape: bf16[128,128], index: 4, kind: input, shape index: {}]   ;;  %s1067_s5 = inlined_call_operand.vmem [shape: f32[1,128], index: 5, kind: input, shape index: {}]   ;;  %s1068_s6 = inlined_call_operand.hbm [shape: bf16[128,128], index: 6, kind: input, shape index: {}]   ;;  %s1069_s7 = inlined_call_operand.vmem [shape: f32[1,128], index: 7, kind: input, shape index: {}]   ;;  %s1070_s8 = inlined_call_operand.hbm [shape: f32[16,128], index: 8, kind: output, shape index: {}]  }
   0x1   :  { %14 = vsyncpa [#allocation6], 0 }
   0x2   :  { %15 = vsyncpa [#allocation9], 0 }
   0x3   :  { %16 = vsyncpa [#allocation4], 0  ;;  %s916_s27 = smov [#allocation5]   ;;  %s917_s29 = smov [#allocation8]  }
   0x4   :  { %s34_s28 = sshll.u32 %s916_s27, 4  ;;  %s60_s30 = sshll.u32 %s917_s29, 4  ;;  %s35_s28 = int_to_ptr.vmem [resolvable:$true] %s34_s28  ;;  %s61_s30 = int_to_ptr.vmem [resolvable:$true] %s60_s30 }
   0x5   :  { %s796_s9 = scalar_lea.vmem %s35_s28, 128  ;;  %p801_p1 = scmp.lt.s32.totalorder %s35_s28, %s35_s28 }
   0x6   :  { %p797_p0 = scmp.ne.s32.totalorder %s35_s28, %s796_s9  ;;  %p802_p2 = scmp.lt.s32.totalorder %s796_s9, %s796_s9 }
   0x8   :  { %p803_p3 = por %p802_p2, %p801_p1 }
   0xa   :  { %p804_p4 = pnand %p803_p3, %p797_p0 }
   0xc   :  { %807 = shalt.err (!%p804_p4)
}
   0xd   :  { %s918_s10 = smov 64   ;;  %s919_s11 = smov 4  }
   0xe   :  { %40 = dma.hbm_to_vmem [thread:$0]  %s1063_s1, 128, %s35_s28, [#allocation6], %s918_s10, %s918_s10, %s919_s11  }
   0xf   :  { %s816_s14 = scalar_lea.vmem %s61_s30, 1024  ;;  %p821_p6 = scmp.lt.s32.totalorder %s61_s30, %s61_s30 }
  0x10   :  { %p817_p5 = scmp.ne.s32.totalorder %s61_s30, %s816_s14  ;;  %p822_p7 = scmp.lt.s32.totalorder %s816_s14, %s816_s14 }
  0x12   :  { %p823_p8 = por %p822_p7, %p821_p6 }
  0x14   :  { %p824_p9 = pnand %p823_p8, %p817_p5 }
  0x16   :  { %827 = shalt.err (!%p824_p9)
}
  0x17   :  { %66 = dma.hbm_to_vmem [thread:$0]  %s1066_s4, 1024, %s61_s30, [#allocation9], %s918_s10, %s918_s10, %s919_s11  }
  0x18   :  { %s920_s17 = smov [#allocation2]   ;;  %s921_s19 = smov [#allocation7]  }
  0x19   :  { %s22_s18 = sshll.u32 %s920_s17, 4  ;;  %s46_s20 = sshll.u32 %s921_s19, 4  ;;  %s23_s18 = int_to_ptr.vmem [resolvable:$true] %s22_s18  ;;  %s47_s20 = int_to_ptr.vmem [resolvable:$true] %s46_s20 }
  0x1a   :  { %s836_s1 = scalar_lea.vmem %s23_s18, 128  ;;  %p841_p11 = scmp.lt.s32.totalorder %s23_s18, %s23_s18 }
  0x1b   :  { %p837_p10 = scmp.ne.s32.totalorder %s23_s18, %s836_s1  ;;  %p842_p12 = scmp.lt.s32.totalorder %s836_s1, %s836_s1 }
  0x1d   :  { %p843_p13 = por %p842_p12, %p841_p11 }
  0x1f   :  { %p844_p0 = pnand %p843_p13, %p837_p10 }
  0x21   :  { %847 = shalt.err (!%p844_p0)
}
  0x22   :  { %28 = dma.hbm_to_vmem [thread:$0]  %s1062_s0, 128, %s23_s18, [#allocation3], %s918_s10, %s918_s10, %s919_s11  }
  0x23   :  { %s856_s4 = scalar_lea.vmem %s47_s20, 1024  ;;  %p861_p2 = scmp.lt.s32.totalorder %s47_s20, %s47_s20 }
  0x24   :  { %p857_p1 = scmp.ne.s32.totalorder %s47_s20, %s856_s4  ;;  %p862_p3 = scmp.lt.s32.totalorder %s856_s4, %s856_s4 }
  0x26   :  { %p863_p4 = por %p862_p3, %p861_p2 }
  0x28   :  { %p864_p5 = pnand %p863_p4, %p857_p1 }
  0x2a   :  { %867 = shalt.err (!%p864_p5)
}
  0x2b   :  { %52 = dma.hbm_to_vmem [thread:$0]  %s1064_s2, 1024, %s47_s20, [#allocation6], %s918_s10, %s918_s10, %s919_s11  }
  0x2c   :  { %s922_s25 = smov [#allocation10]  }
  0x2d   :  { %s74_s26 = sshll.u32 %s922_s25, 4  ;;  %s75_s26 = int_to_ptr.vmem [resolvable:$true] %s74_s26 }
  0x2e   :  { %s876_s27 = scalar_lea.vmem %s75_s26, 1024  ;;  %p881_p7 = scmp.lt.s32.totalorder %s75_s26, %s75_s26 }
  0x2f   :  { %p877_p6 = scmp.ne.s32.totalorder %s75_s26, %s876_s27  ;;  %p882_p8 = scmp.lt.s32.totalorder %s876_s27, %s876_s27 }
  0x31   :  { %p883_p9 = por %p882_p8, %p881_p7 }
  0x33   :  { %p884_p10 = pnand %p883_p9, %p877_p6 }
  0x35   :  { %887 = shalt.err (!%p884_p10)
}
  0x36   :  { %80 = dma.hbm_to_vmem [thread:$0]  %s1068_s6, 1024, %s75_s26, [#allocation9], %s918_s10, %s918_s10, %s919_s11  }
  0x37   :  { %908 = dma.done.wait [#allocation3], 128  }
  0x38   :  { %909 = vsyncadd [#allocation3], 4294967168 }
  0x39   :  { %910 = dma.done.wait [#allocation6], 1152  }
  0x3a   :  { %911 = vsyncadd [#allocation6], 4294966144 }
  0x3b   :  { %912 = dma.done.wait [#allocation9], 2048  }
  0x3c   :  { %913 = vsyncadd [#allocation9], 4294965248  ;;  %v923_v0 = vmov 0.0   ;;  %vm924_vm0 = vmmov 0   ;;  %v762_v1 = vld [vmem:[#allocation5] sm:$0xff]   ;;  %v1009_v2 = vld [vmem:[#allocation2] sm:$0xff]  }
  0x3d   :  { %672 = vmatprep.subr.bf16.mxu1 %v923_v0  ;;  %674 = vmatprep.mubr.msk.bf16.mxu1 %vm924_vm0, %v923_v0  ;;  %vm131_vm1 = vcmask 130048   ;;  %v764_v3 = vld [vmem:[#allocation7 + $0x38] sm:$0xff]   ;;  %v765_v4 = vld [vmem:[#allocation7 + $0x30] sm:$0xff]   ;;  %v766_v5 = vld [vmem:[#allocation7 + $0x28] sm:$0xff]   ;;  %s925_s9 = smov [#allocation11]  }
  0x3e   :  { %698 = vmatprep.subr.bf16.mxu0 %v923_v0  ;;  %714 = vmatprep.mubr.msk.bf16.mxu0 %vm924_vm0, %v923_v0  ;;  %v767_v6 = vld [vmem:[#allocation7 + $0x20] sm:$0xff]   ;;  %v768_v7 = vld [vmem:[#allocation7 + $0x18] sm:$0xff]   ;;  %v769_v8 = vld [vmem:[#allocation7 + $0x10] sm:$0xff]   ;;  %s593_s10 = sshll.u32 %s925_s9, 4  ;;  %s594_s10 = int_to_ptr.vmem [resolvable:$true] %s593_s10 }
  0x3f   :  { %673 = vmatpush3.bf16.msra.mxu1 %v762_v1  ;;  %v770_v9 = vld [vmem:[#allocation7 + $0x8] sm:$0xff]   ;;  %v771_v10 = vld [vmem:[#allocation7] sm:$0xff]   ;;  %v772_v11 = vld [vmem:[#allocation8 + $0x38] sm:$0xff]   ;;  %s888_s11 = scalar_lea.vmem %s594_s10, 256  ;;  %p893_p12 = scmp.lt.s32.totalorder %s594_s10, %s594_s10 }
  0x40   :  { %678 = vmatprep.subr.bf16.mxu1 %v923_v0  ;;  %699 = vmatpush3.bf16.msra.mxu0 %v772_v11  ;;  %v773_v12 = vld [vmem:[#allocation8 + $0x30] sm:$0xff]   ;;  %v774_v13 = vld [vmem:[#allocation8 + $0x28] sm:$0xff]   ;;  %v775_v14 = vld [vmem:[#allocation8 + $0x20] sm:$0xff]   ;;  %p889_p11 = scmp.ne.s32.totalorder %s594_s10, %s888_s11  ;;  %p894_p13 = scmp.lt.s32.totalorder %s888_s11, %s888_s11 }
  0x41   :  { %700 = vmatprep.subr.bf16.mxu0 %v923_v0  ;;  %v776_v15 = vld [vmem:[#allocation8 + $0x18] sm:$0xff]   ;;  %v777_v21 = vld [vmem:[#allocation8 + $0x10] sm:$0xff]   ;;  %v778_v22 = vld [vmem:[#allocation8 + $0x8] sm:$0xff]  }
  0x42   :  { %675 = vmatmul.mubr.msk.bf16.vlgmr.msra.gmra.mxu1 %vm131_vm1, %v1009_v2  ;;  %v779_v23 = vld [vmem:[#allocation8] sm:$0xff]   ;;  %v610_v24 = vld [vmem:[%s1065_s3] ss:$0 sm:$0xff]  ;;  %v780_v34 = vld [vmem:[#allocation10 + $0x38] sm:$0xff]   ;;  %p895_p0 = por %p894_p13, %p893_p12 }
  0x43   :  { %679 = vmatpush3.bf16.msra.mxu1 %v764_v3  ;;  %694 = vmatprep.mubr.msk.bf16.mxu1 %vm924_vm0, %v923_v0  ;;  %v781_v35 = vld [vmem:[#allocation10 + $0x30] sm:$0xff]   ;;  %v782_v36 = vld [vmem:[#allocation10 + $0x28] sm:$0xff]   ;;  %v783_v37 = vld [vmem:[#allocation10 + $0x20] sm:$0xff]  }
  0x44   :  { %680 = vmatprep.subr.bf16.mxu1 %v923_v0  ;;  %701 = vmatpush3.bf16.msra.mxu0 %v773_v12  ;;  %v784_v38 = vld [vmem:[#allocation10 + $0x18] sm:$0xff]   ;;  %v785_v44 = vld [vmem:[#allocation10 + $0x10] sm:$0xff]   ;;  %v786_v45 = vld [vmem:[#allocation10 + $0x8] sm:$0xff]   ;;  %p896_p1 = pnand %p895_p0, %p889_p11 }
  0x45   :  { %702 = vmatprep.subr.bf16.mxu0 %v923_v0  ;;  %v787_v46 = vld [vmem:[#allocation10] sm:$0xff]   ;;  %v627_v47 = vld [vmem:[%s1067_s5] ss:$0 sm:$0xff] }
  0x46   :  { %v637_v62 = vld [vmem:[%s1069_s7] ss:$0 sm:$0xff] }
  0x47   :  { %681 = vmatpush3.bf16.msra.mxu1 %v765_v4 }
  0x48   :  { %682 = vmatprep.subr.bf16.mxu1 %v923_v0  ;;  %703 = vmatpush3.bf16.msra.mxu0 %v774_v13 }
  0x49   :  { %704 = vmatprep.subr.bf16.mxu0 %v923_v0 }
  0x4b   :  { %683 = vmatpush3.bf16.msra.mxu1 %v766_v5 }
  0x4c   :  { %684 = vmatprep.subr.bf16.mxu1 %v923_v0  ;;  %705 = vmatpush3.bf16.msra.mxu0 %v775_v14 }
  0x4d   :  { %706 = vmatprep.subr.bf16.mxu0 %v923_v0 }
  0x4f   :  { %685 = vmatpush3.bf16.msra.mxu1 %v767_v6 }
  0x50   :  { %686 = vmatprep.subr.bf16.mxu1 %v923_v0  ;;  %707 = vmatpush3.bf16.msra.mxu0 %v776_v15 }
  0x51   :  { %708 = vmatprep.subr.bf16.mxu0 %v923_v0 }
  0x53   :  { %687 = vmatpush3.bf16.msra.mxu1 %v768_v7 }
  0x54   :  { %688 = vmatprep.subr.bf16.mxu1 %v923_v0  ;;  %709 = vmatpush3.bf16.msra.mxu0 %v777_v21 }
  0x55   :  { %710 = vmatprep.subr.bf16.mxu0 %v923_v0 }
  0x57   :  { %689 = vmatpush3.bf16.msra.mxu1 %v769_v8 }
  0x58   :  { %690 = vmatprep.subr.bf16.mxu1 %v923_v0  ;;  %711 = vmatpush3.bf16.msra.mxu0 %v778_v22 }
  0x59   :  { %712 = vmatprep.subr.bf16.mxu0 %v923_v0 }
  0x5b   :  { %691 = vmatpush3.bf16.msra.mxu1 %v770_v9 }
  0x5c   :  { %692 = vmatprep.subr.bf16.mxu1 %v923_v0  ;;  %713 = vmatpush3.bf16.msra.mxu0 %v779_v23 }
  0x5d   :  { %724 = vmatprep.subr.bf16.mxu0 %v923_v0 }
  0x5f   :  { %693 = vmatpush3.bf16.msra.mxu1 %v771_v10 }
  0x60   :  { %718 = vmatprep.subr.bf16.mxu1 %v923_v0 }
 0x102   :  { %v169_v16 = vpop.f32.mrf.mxu1 }
 0x104   :  { %v676_v17 = vpop.f32.mrf.mxu1 }
 0x106   :  { %v172_v18 = vpop.f32.mrf.mxu1 }
 0x107   :  { %v176_v19 = vpack.c.bf16 %v172_v18, %v169_v16 }
 0x108   :  { %v677_v20 = vpop.f32.mrf.mxu1 }
 0x109   :  { %695 = vmatmul.mubr.bf16.vlgmr.msra.gmra.mxu1 %v176_v19 }
 0x10a   :  { %720 = vmatprep.mubr.msk.bf16.mxu1 %vm924_vm0, %v923_v0 }
 0x1c9   :  { %v265_v25 = vpop.f32.mrf.mxu1 }
 0x1ca   :  { %v266_v27 = vadd.f32 %v610_v24, %v265_v25 }
 0x1cb   :  { %v696_v26 = vpop.f32.mrf.mxu1 }
 0x1cc   :  { %v272_v31 = vmax.f32 %v266_v27, 0.0 }
 0x1cd   :  { %v268_v28 = vpop.f32.mrf.mxu1 }
 0x1ce   :  { %v269_v29 = vadd.f32 %v610_v24, %v268_v28 }
 0x1cf   :  { %v697_v30 = vpop.f32.mrf.mxu1 }
 0x1d0   :  { %v273_v32 = vmax.f32 %v269_v29, 0.0 }
 0x1d2   :  { %v274_v33 = vpack.c.bf16 %v273_v32, %v272_v31 }
 0x1d4   :  { %715 = vmatmul.mubr.bf16.vlgmr.msra.gmra.mxu0 %v274_v33 }
 0x1d5   :  { %740 = vmatprep.mubr.msk.bf16.mxu0 %vm924_vm0, %v923_v0  ;;  %725 = vmatpush3.bf16.msra.mxu0 %v780_v34 }
 0x1d6   :  { %726 = vmatprep.subr.bf16.mxu0 %v923_v0 }
 0x1d9   :  { %727 = vmatpush3.bf16.msra.mxu0 %v781_v35 }
 0x1da   :  { %728 = vmatprep.subr.bf16.mxu0 %v923_v0 }
 0x1dd   :  { %729 = vmatpush3.bf16.msra.mxu0 %v782_v36 }
 0x1de   :  { %730 = vmatprep.subr.bf16.mxu0 %v923_v0 }
 0x1e1   :  { %731 = vmatpush3.bf16.msra.mxu0 %v783_v37 }
 0x1e2   :  { %732 = vmatprep.subr.bf16.mxu0 %v923_v0 }
 0x1e5   :  { %733 = vmatpush3.bf16.msra.mxu0 %v784_v38 }
 0x1e6   :  { %734 = vmatprep.subr.bf16.mxu0 %v923_v0 }
 0x1e9   :  { %735 = vmatpush3.bf16.msra.mxu0 %v785_v44 }
 0x1ea   :  { %736 = vmatprep.subr.bf16.mxu0 %v923_v0 }
 0x1ed   :  { %737 = vmatpush3.bf16.msra.mxu0 %v786_v45 }
 0x1ee   :  { %738 = vmatprep.subr.bf16.mxu0 %v923_v0 }
 0x1f1   :  { %739 = vmatpush3.bf16.msra.mxu0 %v787_v46 }
 0x294   :  { %v374_v39 = vpop.f32.mrf.mxu0 }
 0x296   :  { %v716_v40 = vpop.f32.mrf.mxu0 }
 0x298   :  { %v377_v41 = vpop.f32.mrf.mxu0 }
 0x299   :  { %v381_v42 = vpack.c.bf16 %v377_v41, %v374_v39 }
 0x29a   :  { %v717_v43 = vpop.f32.mrf.mxu0 }
 0x29b   :  { %719 = vmatpush3.bf16.msra.mxu1 %v381_v42 }
 0x29c   :  { %744 = vmatprep.subr.bf16.mxu1 %v923_v0 }
 0x29e   :  { %721 = vmatmul.mubr.msk.bf16.vlgmr.msra.gmra.mxu1 %vm131_vm1, %v1009_v2 }
 0x29f   :  { %746 = vmatprep.mubr.msk.bf16.mxu1 %vm924_vm0, %v923_v0 }
 0x35e   :  { %v422_v48 = vpop.f32.mrf.mxu1 }
 0x35f   :  { %v423_v50 = vadd.f32 %v627_v47, %v422_v48 }
 0x360   :  { %v722_v49 = vpop.f32.mrf.mxu1 }
 0x361   :  { %v429_v54 = vmax.f32 %v423_v50, 0.0 }
 0x362   :  { %v425_v51 = vpop.f32.mrf.mxu1 }
 0x363   :  { %v426_v52 = vadd.f32 %v627_v47, %v425_v51 }
 0x364   :  { %v723_v53 = vpop.f32.mrf.mxu1 }
 0x365   :  { %v430_v55 = vmax.f32 %v426_v52, 0.0 }
 0x367   :  { %v431_v56 = vpack.c.bf16 %v430_v55, %v429_v54 }
 0x369   :  { %741 = vmatmul.mubr.bf16.vlgmr.msra.gmra.mxu0 %v431_v56 }
 0x429   :  { %v531_v57 = vpop.f32.mrf.mxu0 }
 0x42b   :  { %v742_v58 = vpop.f32.mrf.mxu0 }
 0x42d   :  { %v534_v59 = vpop.f32.mrf.mxu0 }
 0x42e   :  { %v538_v60 = vpack.c.bf16 %v534_v59, %v531_v57 }
 0x42f   :  { %v743_v61 = vpop.f32.mrf.mxu0 }
 0x430   :  { %745 = vmatpush3.bf16.msra.mxu1 %v538_v60 }
 0x433   :  { %747 = vmatmul.mubr.msk.bf16.vlgmr.msra.gmra.mxu1 %vm131_vm1, %v1009_v2 }
 0x4f3   :  { %v579_v63 = vpop.f32.mrf.mxu1 }
 0x4f4   :  { %v580_v0 = vadd.f32 %v637_v62, %v579_v63 }
 0x4f5   :  { %v748_v1 = vpop.f32.mrf.mxu1 }
 0x4f6   :  { %586 = vst [vmem:[#allocation11] sm:$0xff] %v580_v0 }
 0x4f7   :  { %v582_v3 = vpop.f32.mrf.mxu1 }
 0x4f8   :  { %v583_v4 = vadd.f32 %v637_v62, %v582_v3 }
 0x4f9   :  { %v749_v5 = vpop.f32.mrf.mxu1 }
 0x4fa   :  { %587 = vst [vmem:[#allocation11 + $0x8] sm:$0xff] %v583_v4 }
 0x4fb   :  { %899 = shalt.err (!%p896_p1)
}
 0x4fc   :  { %s926_s12 = smov 128   ;;  %s927_s7 = smov 8  }
 0x4fd   :  { %599 = dma.vmem_to_hbm [thread:$0]  %s594_s10, 256, %s1070_s8, [#allocation4], %s926_s12, %s926_s12, %s927_s7  }
 0x4fe   :  { %914 = dma.done.wait [#allocation4], 256  }
 0x4ff   :  { %915 = vsyncadd [#allocation4], 4294967040 }
 0x500   :  { %603 = vsyncpa [#allocation3], 1 }
 0x501   :  { %604 = vsyncpa [#allocation6], 1 }
 0x502   :  { %605 = vsyncpa [#allocation9], 1 }
 0x503   :  { %606 = vsyncpa [#allocation4], 1 }

</bundles_post_ra>
